<compile_context>
chip_gen: v7x
topology: tpu7x:2x2x1
jax: 0.10.0
libtpu: 0.0.40
codegen_flags: <defaults>
</compile_context>

<pallas_src>
import jax
import jax.numpy as jnp
from jax.experimental import pallas as pl
from jax.experimental.pallas import tpu as pltpu

PACK = 16            # pixels packed per 128-lane row
CH = 8               # per-pixel channel slot width (3 padded to 8 in; 8 out)
LANES = PACK * CH    # 128
TM_ROWS = 128        # packed rows per grid step (= 2048 pixels / step)

# (Cout, Cin) of each conv in the original module, in order.
CONV_DIMS = [(8, 3), (16, 8), (32, 16), (16, 32), (8, 16), (8, 8), (8, 8), (8, 8)]


def _chain_simplified(h, recip):
    """v1..v35 chain, algebraically simplified.

    Exactly equivalent to the literal chain in IEEE fp (v16=(v1-1)/(1-v1) is
    bit-exactly -1) except at the measure-zero pole v1 == 1.
    """
    v1 = 3.0 + h
    s = 6.0 * recip(v1)                                          # v19 == v20 == -v30
    t = jnp.maximum(-s, 0.0) - jnp.minimum(s, 6.0) * jnp.maximum(s, 0.0)
    return 0.5 * recip((v1 + 3.0) * t)                           # v35 = 3 / x2


def _model_kernel(x_ref, w_ref, b_ref, o_ref):
    # x_ref: (TM_ROWS, 128)  -- 16 pixels x 8 channels per lane-row
    # w_ref: (2, 128, 128)   -- kron(I16, W) for conv0 and for folded conv1..7
    # b_ref: (2, 128)        -- per-pixel tiled biases
    h = jnp.dot(x_ref[...], w_ref[0],
                preferred_element_type=jnp.float32) + b_ref[0:1, :]
    v = _chain_simplified(h, lambda z: pl.reciprocal(z, approx=True))
    o_ref[...] = jnp.dot(v, w_ref[1],
                         preferred_element_type=jnp.float32) + b_ref[1:2, :]


def _fold_params(weights, biases):
    """conv0 as (8in,8out) with zero-padded input rows; conv1..7 folded into one."""
    cout0, cin0 = CONV_DIMS[0]
    w0 = weights[0].reshape(cout0, cin0).T.astype(jnp.float32)   # (3, 8)
    w0 = jnp.pad(w0, ((0, CH - cin0), (0, 0)))                   # (8, 8)
    b0 = biases[0].astype(jnp.float32)                           # (8,)

    # other_conv1..other_conv7 are purely linear -> one effective (8,8) matmul.
    w_eff = weights[1].reshape(CONV_DIMS[1][0], CONV_DIMS[1][1]).T.astype(jnp.float32)
    b_eff = biases[1].astype(jnp.float32)
    for (w, b), (cout, cin) in zip(zip(weights[2:], biases[2:]), CONV_DIMS[2:]):
        wi = w.reshape(cout, cin).T.astype(jnp.float32)          # (cin, cout)
        w_eff = w_eff @ wi
        b_eff = b_eff @ wi + b.astype(jnp.float32)
    return w0, b0, w_eff, b_eff


def _pack_lane_dense(w0, b0, w_eff, b_eff):
    """Expand to 128 lanes (16 pixels x 8 channels): block-diagonal kron(I16, W)."""
    eye = jnp.eye(PACK, dtype=jnp.float32)
    w_stack = jnp.stack([jnp.kron(eye, w0), jnp.kron(eye, w_eff)])    # (2,128,128)
    b_stack = jnp.stack([jnp.tile(b0, PACK), jnp.tile(b_eff, PACK)])  # (2,128)
    return w_stack, b_stack


def model_forward(x_nchw, weights, biases):
    x = x_nchw.astype(jnp.float32)
    N, C, H, W = x.shape
    Hp, Wp = H + 2, W + 2                         # padding=1 on the first conv

    w0, b0, w_eff, b_eff = _fold_params(weights, biases)
    w_stack, b_stack = _pack_lane_dense(w0, b0, w_eff, b_eff)
    cout = CONV_DIMS[-1][0]

    # Border pixels see zero input: conv0 -> b0 -> chain -> folded conv.
    # Computed once host-side with exact divides (matches the reference border;
    # |b0| < 1/sqrt(3) keeps v1 in [2.4, 3.6], safely away from poles).
    border = _chain_simplified(b0, lambda z: 1.0 / z) @ w_eff + b_eff   # (8,)

    # Interior pixels only. NCHW -> NHWC -> (pixels, 3ch) -> (rows, 128 lanes).
    M = N * H * W
    tile_pix = TM_ROWS * PACK
    Mp = pl.cdiv(M, tile_pix) * tile_pix          # pixel count padded to tile multiple
    Rp = Mp // PACK                               # packed lane-rows
    grid = Rp // TM_ROWS                          # == 2 for the 1x3x64x64 input

    xm = jnp.transpose(x, (0, 2, 3, 1)).reshape(M, C)
    xm = jnp.pad(xm, ((0, Mp - M), (0, CH - C)))  # single fused pad: tail px + ch 3->8
    x_packed = xm.reshape(Rp, LANES)

    cost = pl.CostEstimate(
        flops=2 * 2 * Rp * LANES * LANES,
        transcendentals=2 * Rp * LANES,
        bytes_accessed=2 * Rp * LANES * 4 + w_stack.size * 4 + b_stack.size * 4,
    )

    out = pl.pallas_call(
        _model_kernel,
        out_shape=jax.ShapeDtypeStruct((Rp, LANES), jnp.float32),
        grid=(grid,),
        in_specs=[
            pl.BlockSpec((TM_ROWS, LANES), lambda i: (i, 0)),
            pl.BlockSpec((2, LANES, LANES), lambda i: (0, 0, 0)),   # VMEM-resident
            pl.BlockSpec((2, LANES), lambda i: (0, 0)),             # VMEM-resident
        ],
        out_specs=pl.BlockSpec((TM_ROWS, LANES), lambda i: (i, 0)),
        compiler_params=pltpu.CompilerParams(
            dimension_semantics=("parallel",)),
        cost_estimate=cost,
    )(x_packed, w_stack, b_stack)

    interior = out.reshape(Mp, CH)[:M, :cout].reshape(N, H, W, cout)
    y_nhwc = jnp.broadcast_to(border, (N, Hp, Wp, cout))
    y_nhwc = y_nhwc.at[:, 1:H + 1, 1:W + 1, :].set(interior)
    return y_nhwc.transpose(0, 3, 1, 2)           # NCHW (N, 8, H+2, W+2)


# ----------------------------- pure-JAX reference ----------------------------

def _elementwise_chain_ref(h):
    """Literal translation of v1..v35 from the PyTorch forward."""
    v1 = 3.0 + h
    v2 = v1 - 1.0
    v3 = v1 * 1.0
    v4 = v1 / 1.0
    v5 = 1.0 - v4
    v6 = 1.0 + v2
    v7 = 1.0 * v3
    v8 = v7 / 1.0
    v9 = -v1
    v10 = v9
    v11 = v8 * 6.0
    v12 = v6 * 6.0
    v13 = v12 - 6.0
    v14 = v13 / 6.0
    v15 = 1.0 / v5
    v16 = v14 * v15
    v17 = v11 / 6.0
    v18 = 3.0 + v17
    v19 = 6.0 / v8
    v20 = 6.0 / v6
    v21 = jnp.minimum(v20, 6.0)
    v22 = jnp.maximum(v19, 0.0)
    v23 = v21 * v22
    v24 = v18 * 6.0
    v25 = v24 / 6.0
    v26 = v23 * 6.0
    v27 = v25 * v26
    v28 = v16 * v27
    v29 = v3 + 3.0
    v30 = 6.0 / v10
    v31 = jnp.maximum(v30, 0.0)
    v32 = v31 * 6.0
    v33 = v29 * v32
    x2 = v28 + v33
    v35 = 3.0 / x2
    # v36 = v16 / 6 is computed in the PyTorch module but unused.
    return v35


def reference_forward(x_nchw, weights, biases):
    x = x_nchw.astype(jnp.float32)
    N, C, H, W = x.shape
    xp = jnp.pad(x, ((0, 0), (0, 0), (1, 1), (1, 1)))
    Hp, Wp = H + 2, W + 2
    h = jnp.transpose(xp, (0, 2, 3, 1)).reshape(N * Hp * Wp, C)

    def conv1x1(t, w, b):
        cout, cin = w.shape[0], w.shape[1]
        return t @ w.reshape(cout, cin).T + b

    h = conv1x1(h, weights[0], biases[0])
    h = _elementwise_chain_ref(h)
    for w, b in zip(weights[1:], biases[1:]):
        h = conv1x1(h, w, b)
    cout = CONV_DIMS[-1][0]
    return h.reshape(N, Hp, Wp, cout).transpose(0, 3, 1, 2)


def init_params(key):
    """Deterministic Conv2d-style init: U(-1/sqrt(fan_in), 1/sqrt(fan_in))."""
    weights, biases = [], []
    for i, (cout, cin) in enumerate(CONV_DIMS):
        kw, kb = jax.random.split(jax.random.fold_in(key, i))
        bound = 1.0 / (cin ** 0.5)
        weights.append(
            jax.random.uniform(kw, (cout, cin, 1, 1), jnp.float32, -bound, bound))
        biases.append(
            jax.random.uniform(kb, (cout,), jnp.float32, -bound, bound))
    return weights, biases


if __name__ == "__main__":
    key = jax.random.PRNGKey(0)
    kx, kp = jax.random.split(key)
    # Module's natural (small) input: 3 channels, 64x64 spatial.
    x1 = jax.random.normal(kx, (1, 3, 64, 64), jnp.float32)
    weights, biases = init_params(kp)

    y = jax.block_until_ready(model_forward(x1, weights, biases))
    y_ref = jax.block_until_ready(reference_forward(x1, weights, biases))

    assert y.shape == (1, 8, 66, 66), y.shape
    assert jnp.allclose(y, y_ref, rtol=5e-3, atol=5e-3), (
        float(jnp.max(jnp.abs(y - y_ref))))
    print("KERNEL_OK")
</pallas_src>

<mosaic_0001>
module attributes {stable_mosaic.version = 11 : i64} {
  func.func @_model_kernel(%arg0: i32, %arg1: memref<128x128xf32, #tpu.memory_space<vmem>>, %arg2: memref<2x128x128xf32, #tpu.memory_space<vmem>>, %arg3: memref<2x128xf32, #tpu.memory_space<vmem>>, %arg4: memref<128x128xf32, #tpu.memory_space<vmem>>) attributes {dimension_semantics = [#tpu.dimension_semantics<parallel>], iteration_bounds = array<i64: 2>, scalar_prefetch = 0 : i64, scratch_operands = 0 : i64, tpu.core_type = #tpu.core_type<tc>, window_params = [{transform_indices = @transform_0, window_bounds = array<i64: 128, 128>}, {pipeline_mode = #tpu.pipeline_mode<synchronous>, transform_indices = @transform_1, window_bounds = array<i64: 2, 128, 128>}, {pipeline_mode = #tpu.pipeline_mode<synchronous>, transform_indices = @transform_2, window_bounds = array<i64: 2, 128>}, {transform_indices = @transform_3, window_bounds = array<i64: 128, 128>}]} {
    %c0 = arith.constant 0 : index
    %c0_0 = arith.constant 0 : index
    %0 = vector.load %arg1[%c0, %c0_0] : memref<128x128xf32, #tpu.memory_space<vmem>>, vector<128x128xf32>
    %c0_1 = arith.constant 0 : index
    %c0_2 = arith.constant 0 : index
    %c0_3 = arith.constant 0 : index
    %1 = vector.load %arg2[%c0_1, %c0_2, %c0_3] : memref<2x128x128xf32, #tpu.memory_space<vmem>>, vector<1x128x128xf32>
    %2 = vector.shape_cast %1 : vector<1x128x128xf32> to vector<128x128xf32>
    %cst = arith.constant dense<0.000000e+00> : vector<128x128xf32>
    %3 = tpu.matmul %0, %2, %cst {dimension_numbers = #tpu.dot_dimension_numbers<[1], [0], [0], [1], [0, 0, 1, 1], [], []>} : vector<128x128xf32>, vector<128x128xf32>, vector<128x128xf32> -> vector<128x128xf32>
    %c0_4 = arith.constant 0 : index
    %c0_5 = arith.constant 0 : index
    %4 = vector.load %arg3[%c0_4, %c0_5] : memref<2x128xf32, #tpu.memory_space<vmem>>, vector<1x128xf32>
    %5 = vector.broadcast %4 : vector<1x128xf32> to vector<128x128xf32>
    %6 = arith.addf %3, %5 : vector<128x128xf32>
    %cst_6 = arith.constant 3.000000e+00 : f32
    %7 = vector.broadcast %cst_6 : f32 to vector<128x128xf32>
    %8 = arith.addf %7, %6 : vector<128x128xf32>
    %9 = tpu.reciprocal %8 {approx = true} : vector<128x128xf32> -> vector<128x128xf32>
    %cst_7 = arith.constant 6.000000e+00 : f32
    %10 = vector.broadcast %cst_7 : f32 to vector<128x128xf32>
    %11 = arith.mulf %10, %9 : vector<128x128xf32>
    %cst_8 = arith.constant 0.000000e+00 : f32
    %12 = vector.broadcast %cst_8 : f32 to vector<128x128xf32>
    %13 = arith.subf %12, %11 : vector<128x128xf32>
    %cst_9 = arith.constant 0.000000e+00 : f32
    %14 = vector.broadcast %cst_9 : f32 to vector<128x128xf32>
    %15 = arith.maximumf %13, %14 : vector<128x128xf32>
    %cst_10 = arith.constant 6.000000e+00 : f32
    %16 = vector.broadcast %cst_10 : f32 to vector<128x128xf32>
    %17 = arith.minimumf %11, %16 : vector<128x128xf32>
    %cst_11 = arith.constant 0.000000e+00 : f32
    %18 = vector.broadcast %cst_11 : f32 to vector<128x128xf32>
    %19 = arith.maximumf %11, %18 : vector<128x128xf32>
    %20 = arith.mulf %17, %19 : vector<128x128xf32>
    %21 = arith.subf %15, %20 : vector<128x128xf32>
    %cst_12 = arith.constant 3.000000e+00 : f32
    %22 = vector.broadcast %cst_12 : f32 to vector<128x128xf32>
    %23 = arith.addf %8, %22 : vector<128x128xf32>
    %24 = arith.mulf %23, %21 : vector<128x128xf32>
    %25 = tpu.reciprocal %24 {approx = true} : vector<128x128xf32> -> vector<128x128xf32>
    %cst_13 = arith.constant 5.000000e-01 : f32
    %26 = vector.broadcast %cst_13 : f32 to vector<128x128xf32>
    %27 = arith.mulf %26, %25 : vector<128x128xf32>
    %c1 = arith.constant 1 : index
    %c0_14 = arith.constant 0 : index
    %c0_15 = arith.constant 0 : index
    %28 = vector.load %arg2[%c1, %c0_14, %c0_15] : memref<2x128x128xf32, #tpu.memory_space<vmem>>, vector<1x128x128xf32>
    %29 = vector.shape_cast %28 : vector<1x128x128xf32> to vector<128x128xf32>
    %cst_16 = arith.constant dense<0.000000e+00> : vector<128x128xf32>
    %30 = tpu.matmul %27, %29, %cst_16 {dimension_numbers = #tpu.dot_dimension_numbers<[1], [0], [0], [1], [0, 0, 1, 1], [], []>} : vector<128x128xf32>, vector<128x128xf32>, vector<128x128xf32> -> vector<128x128xf32>
    %c1_17 = arith.constant 1 : index
    %c0_18 = arith.constant 0 : index
    %31 = vector.load %arg3[%c1_17, %c0_18] : memref<2x128xf32, #tpu.memory_space<vmem>>, vector<1x128xf32>
    %32 = vector.broadcast %31 : vector<1x128xf32> to vector<128x128xf32>
    %33 = arith.addf %30, %32 : vector<128x128xf32>
    %c0_19 = arith.constant 0 : index
    %c0_20 = arith.constant 0 : index
    %34 = vector.load %arg4[%c0_19, %c0_20] : memref<128x128xf32, #tpu.memory_space<vmem>>, vector<128x128xf32>
    tpu.vector_store %arg4[%c0_19, %c0_20], %33 {strides = array<i32>} : memref<128x128xf32, #tpu.memory_space<vmem>>, vector<128x128xf32>,
    return
  }
  func.func @transform_0(%arg0: i32) -> (i32, i32) {
    %c0_i32 = arith.constant 0 : i32
    %c0_i32_0 = arith.constant 0 : i32
    return %arg0, %c0_i32 : i32, i32
  }
  func.func @transform_1(%arg0: i32) -> (i32, i32, i32) {
    %c0_i32 = arith.constant 0 : i32
    %c0_i32_0 = arith.constant 0 : i32
    %c0_i32_1 = arith.constant 0 : i32
    %c0_i32_2 = arith.constant 0 : i32
    return %c0_i32, %c0_i32_0, %c0_i32_1 : i32, i32, i32
  }
  func.func @transform_2(%arg0: i32) -> (i32, i32) {
    %c0_i32 = arith.constant 0 : i32
    %c0_i32_0 = arith.constant 0 : i32
    %c0_i32_1 = arith.constant 0 : i32
    return %c0_i32, %c0_i32_0 : i32, i32
  }
  func.func @transform_3(%arg0: i32) -> (i32, i32) {
    %c0_i32 = arith.constant 0 : i32
    %c0_i32_0 = arith.constant 0 : i32
    return %arg0, %c0_i32 : i32, i32
  }
}

</mosaic_0001>

<bundles_post_ra>
// kernel: tpu_custom_call.1
= control target key start
LH: loop header
LB: loop body
LE: loop exit
PB: predicated region body
PF: predicated region fallthrough
CT: control target
= control target key end

     0   :  { %8 = vsyncpa [#allocation3], 0  ;;  %s1770_s0 = inlined_call_operand.hbm [shape: f32[256,128], index: 0, kind: input, shape index: {}]   ;;  %s1771_s1 = inlined_call_operand.hbm [shape: f32[2,128,128], index: 1, kind: input, shape index: {}]   ;;  %s1772_s2 = inlined_call_operand.vmem [shape: f32[2,128], index: 2, kind: input, shape index: {}]   ;;  %s1773_s3 = inlined_call_operand.hbm [shape: f32[256,128], index: 3, kind: output, shape index: {}]  }
   0x1   :  { %10 = vsyncpa [#allocation3 + $0x1], 0 }
   0x2   :  { %11 = vsyncpa [#allocation6], 0 }
   0x3   :  { %12 = vsyncpa [#allocation4], 0 }
   0x4   :  { %14 = vsyncpa [#allocation4 + $0x1], 0  ;;  %s1418_s12 = smov 0   ;;  %s1420_s13 = smov 0  }
   0x5   :  { %s1422_s14 = smov 0   ;;  %s1424_s15 = smov 0  }
   0x6 LB: > { %s1439_s16 = sadd.s32 4294967295, %s1389_s15   ;;  %s876_s17 = sadd.s32 4294967294, %s1389_s15   ;;  %s1389_s15 = sphi %s1424_s15, %s1793_s15   ;;  %s1385_s14 = sphi %s1422_s14, %s1792_s14   ;;  %s1381_s13 = sphi %s1420_s13, %s1791_s13   ;;  %s1377_s12 = sphi %s1418_s12, %s1790_s12  }
   0x7   : > { %p40_p0 = scmp.ne.s32.totalorder %s1381_s13, %s1377_s12  ;;  %p1774_p1 = scmp.eq.s32.totalorder %s1439_s16, 0 }
   0x8   : > { %p112_p3 = scmp.eq.s32.totalorder %s876_s17, 1  ;;  %p877_p5 = scmp.ge.s32.totalorder %s1389_s15, 1 }
   0x9   : > { %p1448_p4 = por %p1774_p1, %p40_p0  ;;  %p119_p7 = scmp.lt.s32.totalorder %s1389_s15, 3 }
   0xa   : > { %p1453_p6 = por %p112_p3, %p40_p0  ;;  %s1391_s21 = smov [#allocation5]  }
   0xb   : > { %s1777_s18 = scalar_select %p1448_p4, 1, 0 }
   0xc   : > { %s1778_s19 = scalar_select %p1453_p6, 1, 0 }
   0xd   : > { %p1458_p8 = pnand %p877_p5, %p119_p7  ;;  %s131_s22 = sshll.u32 %s1391_s21, 4  ;;  %s1462_s22 = int_to_ptr.vmem [resolvable:$true] %s131_s22 }
   0xe   : > { %s1474_s24 = sadd.s32 1, %s1389_s15   ;;  %s27_s25 = sadd.s32 1, %s1385_s14 }
   0xf   : > { %s1779_s20 = scalar_select %p1458_p8, 1, 0 }
  0x10   : > { %p1144_p9 = pneg %p1458_p8  ;;  %s24_s26 = ssub.s32 %s1389_s15, %s1474_s24 }
  0x11   : > { %s1261_s29 = scalar_lea.hbm %s1771_s1, 4096 }
  0x12   : > { %p1469_p11 = pnand %p1144_p9, %p1774_p1  ;;  %p1262_p12 = scmp.ne.s32.totalorder %s1771_s1, %s1261_s29 }
  0x13   : > { %p1268_p5 = scmp.lt.u32.totalorder %s1261_s29, %s1771_s1 }
  0x14   : > { %p1263_p13 = pneg %p1469_p11 }
  0x16   : > { %p1264_p0 = pnand %p1263_p13, %p1262_p12 }
  0x18   : > { %p1265_p3 = pneg %p1264_p0 }
  0x1a   : > { %p1270_p7 = pnand %p1268_p5, %p1265_p3 }
  0x1c   : > { %1273 = shalt.err (!%p1270_p7)
}
  0x1d   : > { %s1274_s7 = scalar_lea.vmem %s1462_s22, 4096  ;;  %p1282_p2 = scmp.lt.s32.totalorder %s1462_s22, %s1462_s22 }
  0x1e   : > { %p1275_p9 = scmp.ne.s32.totalorder %s1462_s22, %s1274_s7  ;;  %p1283_p6 = scmp.lt.s32.totalorder %s1274_s7, %s1274_s7 }
  0x20   : > { %p1277_p10 = pnand %p1275_p9, %p1263_p13  ;;  %p1284_p4 = por %p1283_p6, %p1282_p2 }
  0x22   : > { %p1278_p1 = pneg %p1277_p10 }
  0x24   : > { %p1285_p8 = pnand %p1284_p4, %p1278_p1 }
  0x26   : > { %1288 = shalt.err (!%p1285_p8)
}
  0x27   : > { %s1392_s8 = smov 128   ;;  %s1393_s9 = smov 8  }
  0x28   : > { %1147 = dma.hbm_to_vmem [thread:$0]  (!%p1469_p11), %s1771_s1, 4096, %s1462_s22, [#allocation6], %s1392_s8, %s1392_s8, %s1393_s9  }
  0x29   : > { %p25_p1 = scmp.eq.s32.totalorder %s24_s26, 0  ;;  %p34_p2 = scmp.ne.s32.totalorder %s1385_s14, %s1381_s13 }
  0x2a   : > { %p35_p4 = scmp.eq.s32.totalorder %s1389_s15, 0  ;;  %p1157_p6 = scmp.lt.s32.totalorder %s1389_s15, 2 }
  0x2b   : > { %s1508_s17 = scalar_select %p25_p1, %s1385_s14, %s27_s25  }
  0x2c   : > { %p36_p8 = por %p35_p4, %p34_p2  ;;  %p1781_p10 = scmp.eq.s32.totalorder %s1439_s16, 1 }
  0x2d   : > { %s148_s23 = sand.u32 1, %s1385_s14   ;;  %s894_s27 = sshll.u32 %s1389_s15, 11 }
  0x2e   : > { %p1512_p12 = por %p1781_p10, %p34_p2  ;;  %s880_s28 = sshll.u32 %s148_s23, 7 }
  0x2f   : > { %s1521_s4 = scalar_lea.hbm %s1770_s0, %s894_s27  ;;  %s152_s22 = scalar_lea.vmem [#allocation2], %s880_s28 }
  0x30   : > { %s159_s25 = sshll.u32 %s152_s22, 4  ;;  %p1523_p11 = pnand %p1157_p6, %p36_p8  ;;  %s1527_s25 = int_to_ptr.vmem [resolvable:$true] %s159_s25 }
  0x31   : > { %s1529_s5 = scalar_lea.sflag [#allocation3], %s148_s23  ;;  %s1289_s6 = scalar_lea.hbm %s1521_s4, 2048 }
  0x32   : > { %p1290_p13 = scmp.ne.s32.totalorder %s1521_s4, %s1289_s6  ;;  %p1291_p0 = pneg %p1523_p11 }
  0x33   : > { %s1294_s11 = scalar_lea.hbm %s1770_s0, 4096  ;;  %p1295_p7 = scmp.lt.u32.totalorder %s1521_s4, %s1770_s0 }
  0x34   : > { %p1292_p3 = pnand %p1291_p0, %p1290_p13  ;;  %p1296_p9 = scmp.lt.u32.totalorder %s1294_s11, %s1289_s6 }
  0x35   : > { %p1298_p2 = scmp.lt.u32.totalorder %s1289_s6, %s1521_s4 }
  0x36   : > { %p1293_p5 = pneg %p1292_p3  ;;  %p1297_p1 = por %p1296_p9, %p1295_p7 }
  0x38   : > { %p1299_p4 = por %p1298_p2, %p1297_p1 }
  0x3a   : > { %p1300_p6 = pnand %p1299_p4, %p1293_p5 }
  0x3c   : > { %1303 = shalt.err (!%p1300_p6)
}
  0x3d   : > { %s1304_s23 = scalar_lea.vmem %s1527_s25, 2048  ;;  %s1394_s29 = smov [#allocation2]  }
  0x3e   : > { %p1305_p8 = scmp.ne.s32.totalorder %s1527_s25, %s1304_s23  ;;  %s1309_s30 = sshll.u32 %s1394_s29, 4  ;;  %s1310_s30 = int_to_ptr.vmem [resolvable:$false] %s1309_s30 }
  0x3f   : > { %s1311_s22 = scalar_lea.vmem %s1310_s30, 4096  ;;  %p1312_p3 = scmp.lt.s32.totalorder %s1527_s25, %s1310_s30 }
  0x40   : > { %p1307_p10 = pnand %p1305_p8, %p1291_p0  ;;  %p1313_p7 = scmp.lt.s32.totalorder %s1311_s22, %s1304_s23 }
  0x42   : > { %p1308_p13 = pneg %p1307_p10  ;;  %p1314_p9 = por %p1313_p7, %p1312_p3 }
  0x44   : > { %p1315_p1 = pnand %p1314_p9, %p1308_p13 }
  0x46   : > { %1318 = shalt.err (!%p1315_p1)
}
  0x47   : > { %1151 = dma.hbm_to_vmem [thread:$0]  (!%p1523_p11), %s1521_s4, 2048, %s1527_s25, %s1529_s5, %s1392_s8, %s1392_s8, %s1393_s9  }
  0x48   : > { %p1784_p0 = scmp.ne.s32.totalorder %s1779_s20, 0 }
  0x49   : > { %s1563_s6 = sand.u32 (!%p1784_p0), 1, %s1381_s13   ;;  %p1785_p5 = scmp.ne.s32.totalorder (!%p1784_p0), %s1777_s18, 0 }
  0x4a   : > { %171 = sbr.rel (%p1784_p0) target bundleno = 650 (0x28a), region = 32  ;;  %s884_s7 = sshll.u32 (!%p1784_p0), %s1563_s6, 7 }
  0x4b   : > { %s174_s10 = scalar_lea.sflag (!%p1784_p0), [#allocation3], %s1563_s6  ;;  %s1569_s26 = scalar_lea.vmem (!%p1784_p0), [#allocation2], %s884_s7 }
  0x51   : > { %1364 = dma.done.wait (%p1785_p5), %s174_s10, 2048  }
  0x52   : > { %1366 = vsyncadd (%p1785_p5), %s174_s10, 4294965248  ;;  %p1786_p11 = scmp.eq.s32.totalorder %s1439_s16, 0 }
  0x54   : > { %1368 = dma.done.wait (%p1786_p11), [#allocation6], 4096   ;;  %p1787_p2 = pmov %p1786_p11 }
  0x55   : > { %v222_v0 = vld [vmem:[#allocation5] sm:$0xff]  ;;  %v223_v1 = vld [vmem:[#allocation5 + $0x8] sm:$0xff]  ;;  %v224_v2 = vld [vmem:[#allocation5 + $0x10] sm:$0xff]  ;;  %s1701_s4 = scalar_lea.vmem [#allocation7], %s884_s7  ;;  %s895_s25 = sshll.u32 %s1439_s16, 11 }
  0x56   : > { %1370 = vsyncadd (%p1787_p2), [#allocation6], 4294963200  ;;  %v1072_v3 = vpack.c.bf16 %v223_v1, %v222_v0  ;;  %v225_v4 = vld [vmem:[#allocation5 + $0x18] sm:$0xff]  ;;  %v226_v6 = vld [vmem:[#allocation5 + $0x20] sm:$0xff]  ;;  %s793_s5 = sshll.u32 %s1701_s4, 4  ;;  %s1722_s28 = scalar_lea.hbm %s1773_s3, %s895_s25  ;;  %s1724_s5 = int_to_ptr.vmem [resolvable:$true] %s793_s5 }
  0x57   : > { %v1076_v5 = vpack.c.bf16 %v225_v4, %v224_v2  ;;  %v227_v7 = vld [vmem:[#allocation5 + $0x28] sm:$0xff]  ;;  %v206_v9 = vld [vmem:[%s1569_s26] sm:$0xff]  ;;  %v228_v10 = vld [vmem:[#allocation5 + $0x30] sm:$0xff]  ;;  %s780_s16 = scalar_lea.sflag [#allocation4], %s1563_s6  ;;  %s1319_s23 = scalar_lea.vmem %s1724_s5, 2048 }
  0x58   : > { %1073 = vmatprep.subr.bf16.mxu0 %v1072_v3  ;;  %v1080_v8 = vpack.c.bf16 %v227_v7, %v226_v6  ;;  %v229_v11 = vld [vmem:[#allocation5 + $0x38] sm:$0xff]  ;;  %992 = vmatprep.mubr.f32.mxu0 %v206_v9  ;;  %v230_v13 = vld [vmem:[#allocation5 + $0x40] sm:$0xff]  ;;  %v231_v14 = vld [vmem:[#allocation5 + $0x48] sm:$0xff]  ;;  %p1320_p4 = scmp.ne.s32.totalorder %s1724_s5, %s1319_s23  ;;  %s1395_s29 = smov [#allocation7]  }
  0x59   : > { %1075 = vmatpush3.bf16.msra.mxu0 %v1072_v3  ;;  %v1084_v12 = vpack.c.bf16 %v229_v11, %v228_v10  ;;  %v1088_v15 = vpack.c.bf16 %v231_v14, %v230_v13  ;;  %v232_v16 = vld [vmem:[#allocation5 + $0x50] sm:$0xff]  ;;  %v233_v17 = vld [vmem:[#allocation5 + $0x58] sm:$0xff]  ;;  %v234_v19 = vld [vmem:[#allocation5 + $0x60] sm:$0xff]  ;;  %s1323_s30 = sshll.u32 %s1395_s29, 4  ;;  %s1324_s30 = int_to_ptr.vmem [resolvable:$false] %s1323_s30 }
  0x5a   : > { %1077 = vmatprep.subr.bf16.mxu0 %v1076_v5  ;;  %v1092_v18 = vpack.c.bf16 %v233_v17, %v232_v16  ;;  %v235_v20 = vld [vmem:[#allocation5 + $0x68] sm:$0xff]  ;;  %v236_v22 = vld [vmem:[#allocation5 + $0x70] sm:$0xff]  ;;  %v237_v23 = vld [vmem:[#allocation5 + $0x78] sm:$0xff]  ;;  %p1321_p6 = pnand %p1320_p4, %p1512_p12  ;;  %s1325_s22 = scalar_lea.vmem %s1324_s30, 4096 }
  0x5b   : > { %v1096_v21 = vpack.c.bf16 %v235_v20, %v234_v19  ;;  %v1100_v24 = vpack.c.bf16 %v237_v23, %v236_v22  ;;  %v207_v25 = vld [vmem:[%s1569_s26 + $0x8] sm:$0xff]  ;;  %v208_v26 = vld [vmem:[%s1569_s26 + $0x10] sm:$0xff]  ;;  %v209_v27 = vld [vmem:[%s1569_s26 + $0x18] sm:$0xff]  ;;  %p1326_p10 = scmp.lt.s32.totalorder %s1724_s5, %s1324_s30  ;;  %p1327_p13 = scmp.lt.s32.totalorder %s1325_s22, %s1319_s23 }
  0x5c   : > { %v210_v28 = vld [vmem:[%s1569_s26 + $0x20] sm:$0xff]  ;;  %v211_v29 = vld [vmem:[%s1569_s26 + $0x28] sm:$0xff]  ;;  %v212_v30 = vld [vmem:[%s1569_s26 + $0x30] sm:$0xff]  ;;  %p1322_p8 = pneg %p1321_p6 }
  0x5d   : > { %1079 = vmatpush3.bf16.msra.mxu0 %v1076_v5  ;;  %v213_v31 = vld [vmem:[%s1569_s26 + $0x38] sm:$0xff]  ;;  %v214_v32 = vld [vmem:[%s1569_s26 + $0x40] sm:$0xff]  ;;  %v215_v33 = vld [vmem:[%s1569_s26 + $0x48] sm:$0xff]  ;;  %p1328_p3 = por %p1327_p13, %p1326_p10 }
  0x5e   : > { %1081 = vmatprep.subr.bf16.mxu0 %v1080_v8  ;;  %v216_v34 = vld [vmem:[%s1569_s26 + $0x50] sm:$0xff]  ;;  %v217_v35 = vld [vmem:[%s1569_s26 + $0x58] sm:$0xff]  ;;  %v218_v36 = vld [vmem:[%s1569_s26 + $0x60] sm:$0xff] }
  0x5f   : > { %v219_v37 = vld [vmem:[%s1569_s26 + $0x68] sm:$0xff]  ;;  %v220_v38 = vld [vmem:[%s1569_s26 + $0x70] sm:$0xff]  ;;  %v221_v39 = vld [vmem:[%s1569_s26 + $0x78] sm:$0xff]  ;;  %p1329_p7 = pnand %p1328_p3, %p1322_p8 }
  0x60   : > { %v597_v40 = vld [vmem:[#allocation5 + $0x80] sm:$0xff]  ;;  %v598_v41 = vld [vmem:[#allocation5 + $0x88] sm:$0xff]  ;;  %v599_v43 = vld [vmem:[#allocation5 + $0x90] sm:$0xff] }
  0x61   : > { %1083 = vmatpush3.bf16.msra.mxu0 %v1080_v8  ;;  %v1104_v42 = vpack.c.bf16 %v598_v41, %v597_v40  ;;  %v600_v44 = vld [vmem:[#allocation5 + $0x98] sm:$0xff]  ;;  %v601_v46 = vld [vmem:[#allocation5 + $0xa0] sm:$0xff]  ;;  %v602_v47 = vld [vmem:[#allocation5 + $0xa8] sm:$0xff] }
  0x62   : > { %1085 = vmatprep.subr.bf16.mxu0 %v1084_v12  ;;  %v1108_v45 = vpack.c.bf16 %v600_v44, %v599_v43  ;;  %v1112_v48 = vpack.c.bf16 %v602_v47, %v601_v46  ;;  %v603_v49 = vld [vmem:[#allocation5 + $0xb0] sm:$0xff]  ;;  %v604_v50 = vld [vmem:[#allocation5 + $0xb8] sm:$0xff]  ;;  %v605_v52 = vld [vmem:[#allocation5 + $0xc0] sm:$0xff] }
  0x63   : > { %1105 = vmatprep.subr.bf16.mxu1 %v1104_v42  ;;  %v1116_v51 = vpack.c.bf16 %v604_v50, %v603_v49  ;;  %v606_v53 = vld [vmem:[#allocation5 + $0xc8] sm:$0xff]  ;;  %v607_v55 = vld [vmem:[#allocation5 + $0xd0] sm:$0xff]  ;;  %v608_v56 = vld [vmem:[#allocation5 + $0xd8] sm:$0xff] }
  0x64   : > { %1107 = vmatpush3.bf16.msra.mxu1 %v1104_v42  ;;  %v1120_v54 = vpack.c.bf16 %v606_v53, %v605_v52  ;;  %v1124_v57 = vpack.c.bf16 %v608_v56, %v607_v55  ;;  %v609_v58 = vld [vmem:[#allocation5 + $0xe0] sm:$0xff]  ;;  %v610_v59 = vld [vmem:[#allocation5 + $0xe8] sm:$0xff]  ;;  %v611_v61 = vld [vmem:[#allocation5 + $0xf0] sm:$0xff] }
  0x65   : > { %1087 = vmatpush3.bf16.msra.mxu0 %v1084_v12  ;;  %1109 = vmatprep.subr.bf16.mxu1 %v1108_v45  ;;  %v1128_v60 = vpack.c.bf16 %v610_v59, %v609_v58  ;;  %v612_v62 = vld [vmem:[#allocation5 + $0xf8] sm:$0xff]  ;;  %v1598_v0 = vld [vmem:[%s1772_s2] ss:$0 sm:$0xff] }
  0x66   : > { %1089 = vmatprep.subr.bf16.mxu0 %v1088_v15  ;;  %v1132_v63 = vpack.c.bf16 %v612_v62, %v611_v61 }
  0x68   : > { %1111 = vmatpush3.bf16.msra.mxu1 %v1108_v45 }
  0x69   : > { %1091 = vmatpush3.bf16.msra.mxu0 %v1088_v15  ;;  %1113 = vmatprep.subr.bf16.mxu1 %v1112_v48 }
  0x6a   : > { %1093 = vmatprep.subr.bf16.mxu0 %v1092_v18 }
  0x6c   : > { %1115 = vmatpush3.bf16.msra.mxu1 %v1112_v48 }
  0x6d   : > { %1095 = vmatpush3.bf16.msra.mxu0 %v1092_v18  ;;  %1117 = vmatprep.subr.bf16.mxu1 %v1116_v51 }
  0x6e   : > { %1097 = vmatprep.subr.bf16.mxu0 %v1096_v21 }
  0x70   : > { %1119 = vmatpush3.bf16.msra.mxu1 %v1116_v51 }
  0x71   : > { %1099 = vmatpush3.bf16.msra.mxu0 %v1096_v21  ;;  %1121 = vmatprep.subr.bf16.mxu1 %v1120_v54 }
  0x72   : > { %1101 = vmatprep.subr.bf16.mxu0 %v1100_v24 }
  0x74   : > { %1123 = vmatpush3.bf16.msra.mxu1 %v1120_v54 }
  0x75   : > { %1103 = vmatpush3.bf16.msra.mxu0 %v1100_v24  ;;  %1125 = vmatprep.subr.bf16.mxu1 %v1124_v57 }
  0x78   : > { %993 = vmatmul.mubr.f32.vlgmr.msra.gmra.mrb[0].mxu0 %v207_v25  ;;  %1127 = vmatpush3.bf16.msra.mxu1 %v1124_v57 }
  0x79   : > { %995 = vmatprep.mubr.f32.mxu0 %v208_v26  ;;  %1129 = vmatprep.subr.bf16.mxu1 %v1128_v60 }
  0x7c   : > { %996 = vmatmul.mubr.f32.gmra.mrb[2].mxu0 %v209_v27  ;;  %1131 = vmatpush3.bf16.msra.mxu1 %v1128_v60 }
  0x7d   : > { %998 = vmatprep.mubr.f32.mxu0 %v210_v28  ;;  %1133 = vmatprep.subr.bf16.mxu1 %v1132_v63 }
  0x80   : > { %999 = vmatmul.mubr.f32.gmra.mrb[4].mxu0 %v211_v29  ;;  %1135 = vmatpush3.bf16.msra.mxu1 %v1132_v63 }
  0x81   : > { %1001 = vmatprep.mubr.f32.mxu0 %v212_v30 }
  0x84   : > { %1002 = vmatmul.mubr.f32.gmra.mrb[6].mxu0 %v213_v31 }
  0x85   : > { %1004 = vmatprep.mubr.f32.mxu0 %v214_v32 }
  0x88   : > { %1005 = vmatmul.mubr.f32.gmra.mrb[8].mxu0 %v215_v33 }
  0x89   : > { %1007 = vmatprep.mubr.f32.mxu0 %v216_v34 }
  0x8c   : > { %1008 = vmatmul.mubr.f32.gmra.mrb[10].mxu0 %v217_v35 }
  0x8d   : > { %1010 = vmatprep.mubr.f32.mxu0 %v218_v36 }
  0x90   : > { %1011 = vmatmul.mubr.f32.gmra.mrb[12].mxu0 %v219_v37 }
  0x91   : > { %1013 = vmatprep.mubr.f32.mxu0 %v220_v38 }
  0x94   : > { %1014 = vmatmul.mubr.f32.gmra.mrb[14].mxu0 %v221_v39 }
 0x14b   : > { %v994_v1 = vpop.f32.mrb[0].mxu0 }
 0x14c   : > { %v315_v2 = vadd.f32 %v994_v1, %v1598_v0  ;;  %v309_v3 = vpop.f32.mrb[1].mxu0 }
 0x14d   : > { %v310_v14 = vadd.f32 %v1598_v0, %v309_v3 }
 0x14e   : > { %v1601_v4 = vadd.f32 3.0, %v315_v2 }
 0x14f   : > { %v997_v5 = vpop.f32.mrb[2].mxu0  ;;  %v388_v19 = vadd.f32 3.0, %v310_v14 }
 0x150   : > { %v325_v6 = vadd.f32 %v997_v5, %v1598_v0  ;;  %v319_v7 = vpop.f32.mrb[3].mxu0  ;;  %1197 = vrcp.f32 %v1601_v4  ;;  %v533_v60 = vadd.f32 3.0, %v1601_v4 }
 0x151   : > { %v320_v8 = vadd.f32 %v1598_v0, %v319_v7  ;;  %v1633_v63 = vadd.f32 3.0, %v388_v19 }
 0x152   : > { %v1606_v9 = vadd.f32 3.0, %v325_v6 }
 0x153   : > { %v1608_v10 = vadd.f32 3.0, %v320_v8  ;;  %v1000_v11 = vpop.f32.mrb[4].mxu0 }
 0x154   : > { %v335_v12 = vadd.f32 %v1000_v11, %v1598_v0  ;;  %v329_v13 = vpop.f32.mrb[5].mxu0  ;;  %v1636_v1 = vadd.f32 3.0, %v1606_v9 }
 0x155   : > { %1199 = vrcp.f32 %v1608_v10  ;;  %v330_v15 = vadd.f32 %v1598_v0, %v329_v13  ;;  %v534_v6 = vadd.f32 3.0, %v1608_v10 }
 0x156   : > { %1201 = vrcp.f32 %v1606_v9  ;;  %v393_v17 = vadd.f32 3.0, %v335_v12 }
 0x157   : > { %v1003_v16 = vpop.f32.mrb[6].mxu0  ;;  %v392_v21 = vadd.f32 3.0, %v330_v15 }
 0x158   : > { %v339_v18 = vpop.f32.mrb[7].mxu0  ;;  %v345_v20 = vadd.f32 %v1003_v16, %v1598_v0  ;;  %1203 = vrcp.f32 %v393_v17  ;;  %v1641_v7 = vadd.f32 3.0, %v393_v17 }
 0x159   : > { %v340_v22 = vadd.f32 %v1598_v0, %v339_v18  ;;  %1205 = vrcp.f32 %v388_v19  ;;  %v1646_v16 = vadd.f32 3.0, %v392_v21 }
 0x15a   : > { %v1198_v24 = vpop.eup %1197  ;;  %v395_v26 = vadd.f32 3.0, %v345_v20  ;;  %1207 = vrcp.f32 %v392_v21 }
 0x15b   : > { %v1006_v23 = vpop.f32.mrb[8].mxu0  ;;  %v421_v28 = vmul.f32 6.0, %v1198_v24  ;;  %v1617_v29 = vadd.f32 3.0, %v340_v22 }
 0x15c   : > { %v349_v25 = vpop.f32.mrb[9].mxu0  ;;  %1209 = vrcp.f32 %v395_v26  ;;  %v355_v35 = vadd.f32 %v1006_v23, %v1598_v0  ;;  %v1648_v19 = vadd.f32 3.0, %v395_v26 }
 0x15d   : > { %v350_v31 = vadd.f32 %v1598_v0, %v349_v25  ;;  %v437_v36 = vsub.f32 0.0, %v421_v28  ;;  %1211 = vrcp.f32 %v1617_v29  ;;  %v469_v38 = vmin.f32 %v421_v28, 6.0 }
 0x15e   : > { %v485_v39 = vmax.f32 %v421_v28, 0.0  ;;  %v1626_v47 = vadd.f32 3.0, %v355_v35 }
 0x15f   : > { %v1200_v27 = vpop.eup %1199  ;;  %v1009_v30 = vpop.f32.mrb[10].mxu0  ;;  %v1624_v41 = vadd.f32 3.0, %v350_v31  ;;  %v453_v49 = vmax.f32 %v437_v36, 0.0 }
 0x160   : > { %v1620_v32 = vpop.f32.mrb[11].mxu0  ;;  %v1202_v33 = vpop.eup %1201  ;;  %v422_v34 = vmul.f32 6.0, %v1200_v27  ;;  %v501_v52 = vmul.f32 %v485_v39, %v469_v38  ;;  %v365_v13 = vadd.f32 %v1009_v30, %v1598_v0 }
 0x161   : > { %v423_v40 = vmul.f32 6.0, %v1202_v33  ;;  %1213 = vrcp.f32 %v1624_v41  ;;  %v360_v33 = vadd.f32 %v1598_v0, %v1620_v32 }
 0x162   : > { %v438_v43 = vsub.f32 0.0, %v422_v34  ;;  %v470_v44 = vmin.f32 %v422_v34, 6.0  ;;  %v486_v45 = vmax.f32 %v422_v34, 0.0  ;;  %v1204_v46 = vpop.eup %1203  ;;  %1215 = vrcp.f32 %v1626_v47 }
 0x163   : > { %v1012_v37 = vpop.f32.mrb[12].mxu0  ;;  %v1206_v48 = vpop.eup %1205  ;;  %v439_v53 = vsub.f32 0.0, %v423_v40  ;;  %v471_v54 = vmin.f32 %v423_v40, 6.0  ;;  %v487_v56 = vmax.f32 %v423_v40, 0.0  ;;  %v425_v59 = vmul.f32 6.0, %v1204_v46 }
 0x164   : > { %v369_v42 = vpop.f32.mrb[13].mxu0  ;;  %v1208_v51 = vpop.eup %1207  ;;  %v454_v57 = vmax.f32 %v438_v43, 0.0  ;;  %v502_v58 = vmul.f32 %v486_v45, %v470_v44  ;;  %v1631_v62 = vmul.f32 6.0, %v1206_v48  ;;  %v517_v3 = vsub.f32 %v453_v49, %v501_v52 }
 0x165   : > { %v424_v2 = vmul.f32 6.0, %v1208_v51  ;;  %v1638_v5 = vmax.f32 %v439_v53, 0.0  ;;  %v1643_v4 = vmul.f32 %v487_v56, %v471_v54  ;;  %v441_v12 = vsub.f32 0.0, %v425_v59 }
 0x166   : > { %v1210_v61 = vpop.eup %1209  ;;  %v518_v11 = vsub.f32 %v454_v57, %v502_v58  ;;  %v473_v14 = vmin.f32 %v425_v59, 6.0  ;;  %v489_v15 = vmax.f32 %v425_v59, 0.0  ;;  %v436_v20 = vsub.f32 0.0, %v1631_v62 }
 0x167   : > { %v1015_v50 = vpop.f32.mrb[14].mxu0  ;;  %v1212_v8 = vpop.eup %1211  ;;  %v427_v9 = vmul.f32 6.0, %v1210_v61  ;;  %v440_v18 = vsub.f32 0.0, %v424_v2  ;;  %v468_v10 = vmin.f32 %v1631_v62, 6.0  ;;  %v1652_v17 = vmul.f32 %v533_v60, %v517_v3 }
 0x168   : > { %v379_v55 = vpop.f32.mrb[15].mxu0  ;;  %v472_v22 = vmin.f32 %v424_v2, 6.0  ;;  %v488_v23 = vmax.f32 %v424_v2, 0.0  ;;  %v426_v24 = vmul.f32 6.0, %v1212_v8  ;;  %v519_v25 = vsub.f32 %v1638_v5, %v1643_v4 }
 0x169   : > { %v550_v27 = vmul.f32 %v534_v6, %v518_v11  ;;  %v457_v28 = vmax.f32 %v441_v12, 0.0  ;;  %v1656_v21 = vadd.f32 3.0, %v365_v13  ;;  %v505_v31 = vmul.f32 %v489_v15, %v473_v14 }
 0x16a   : > { %v443_v26 = vsub.f32 0.0, %v427_v9  ;;  %v375_v34 = vadd.f32 %v1012_v37, %v1598_v0  ;;  %v456_v35 = vmax.f32 %v440_v18, 0.0  ;;  %v475_v36 = vmin.f32 %v427_v9, 6.0 }
 0x16b   : > { %v1214_v30 = vpop.eup %1213  ;;  %v491_v38 = vmax.f32 %v427_v9, 0.0  ;;  %v370_v39 = vadd.f32 %v1598_v0, %v369_v42  ;;  %v504_v43 = vmul.f32 %v488_v23, %v472_v22  ;;  %v442_v44 = vsub.f32 0.0, %v426_v24 }
 0x16c   : > { %v1216_v40 = vpop.eup %1215  ;;  %1217 = vrcp.f32 %v1656_v21  ;;  %v1663_v45 = vadd.f32 3.0, %v360_v33  ;;  %v428_v46 = vmul.f32 6.0, %v1214_v30  ;;  %v1665_v48 = vadd.f32 3.0, %v375_v34 }
 0x16d   : > { %v385_v49 = vadd.f32 %v1015_v50, %v1598_v0  ;;  %v380_v32 = vadd.f32 %v1598_v0, %v379_v55  ;;  %v459_v37 = vmax.f32 %v443_v26, 0.0  ;;  %v474_v51 = vmin.f32 %v426_v24, 6.0 }
 0x16e   : > { %1219 = vrcp.f32 %v1663_v45  ;;  %v1670_v52 = vadd.f32 3.0, %v370_v39  ;;  %v507_v42 = vmul.f32 %v491_v38, %v475_v36  ;;  %v490_v53 = vmax.f32 %v426_v24, 0.0 }
 0x16f   : > { %v429_v54 = vmul.f32 6.0, %v1216_v40  ;;  %v1672_v56 = vadd.f32 3.0, %v385_v49  ;;  %v521_v57 = vsub.f32 %v457_v28, %v505_v31  ;;  %v1674_v58 = vadd.f32 3.0, %v380_v32 }
 0x170   : > { %v452_v59 = vmax.f32 %v436_v20, 0.0  ;;  %v484_v60 = vmax.f32 %v1631_v62, 0.0  ;;  %v444_v50 = vsub.f32 0.0, %v428_v46  ;;  %v476_v61 = vmin.f32 %v428_v46, 6.0 }
 0x171   : > { %v492_v0 = vmax.f32 %v428_v46, 0.0  ;;  %1221 = vrcp.f32 %v1665_v48  ;;  %v520_v55 = vsub.f32 %v456_v35, %v504_v43  ;;  %v458_v2 = vmax.f32 %v442_v44, 0.0 }
 0x172   : > { %1223 = vrcp.f32 %v1670_v52  ;;  %v500_v3 = vmul.f32 %v484_v60, %v468_v10  ;;  %v523_v5 = vsub.f32 %v459_v37, %v507_v42  ;;  %v506_v6 = vmul.f32 %v490_v53, %v474_v51 }
 0x173   : > { %v445_v8 = vsub.f32 0.0, %v429_v54  ;;  %1225 = vrcp.f32 %v1672_v56  ;;  %v477_v4 = vmin.f32 %v429_v54, 6.0  ;;  %v493_v11 = vmax.f32 %v429_v54, 0.0 }
 0x174   : > { %1227 = vrcp.f32 %v1674_v58  ;;  %v516_v62 = vsub.f32 %v452_v59, %v500_v3  ;;  %v551_v12 = vmul.f32 %v1636_v1, %v519_v25  ;;  %v460_v13 = vmax.f32 %v444_v50, 0.0 }
 0x175   : > { %1229 = vrcp.f32 %v550_v27  ;;  %v508_v14 = vmul.f32 %v492_v0, %v476_v61  ;;  %v553_v9 = vmul.f32 %v1641_v7, %v521_v57  ;;  %v538_v18 = vadd.f32 3.0, %v1617_v29 }
 0x176   : > { %v1218_v15 = vpop.eup %1217  ;;  %v541_v20 = vadd.f32 3.0, %v1626_v47  ;;  %v548_v10 = vmul.f32 %v1633_v63, %v516_v62  ;;  %1231 = vrcp.f32 %v1652_v17  ;;  %v552_v22 = vmul.f32 %v1646_v16, %v520_v55 }
 0x177   : > { %v522_v23 = vsub.f32 %v458_v2, %v506_v6  ;;  %v431_v24 = vmul.f32 6.0, %v1218_v15  ;;  %v555_v1 = vmul.f32 %v1648_v19, %v523_v5  ;;  %v461_v25 = vmax.f32 %v445_v8, 0.0 }
 0x178   : > { %v1220_v28 = vpop.eup %1219  ;;  %v509_v27 = vmul.f32 %v493_v11, %v477_v4  ;;  %1233 = vrcp.f32 %v548_v10  ;;  %v524_v7 = vsub.f32 %v460_v13, %v508_v14  ;;  %v540_v47 = vadd.f32 3.0, %v1624_v41 }
 0x179   : > { %1235 = vrcp.f32 %v551_v12  ;;  %v447_v30 = vsub.f32 0.0, %v431_v24  ;;  %v430_v29 = vmul.f32 6.0, %v1220_v28  ;;  %v479_v63 = vmin.f32 %v431_v24, 6.0 }
 0x17a   : > { %1237 = vrcp.f32 %v553_v9  ;;  %v495_v31 = vmax.f32 %v431_v24, 0.0  ;;  %v554_v16 = vmul.f32 %v538_v18, %v522_v23  ;;  %v525_v19 = vsub.f32 %v461_v25, %v509_v27 }
 0x17b   : > { %v1222_v17 = vpop.eup %1221  ;;  %1239 = vrcp.f32 %v552_v22  ;;  %v446_v26 = vsub.f32 0.0, %v430_v29  ;;  %v478_v33 = vmin.f32 %v430_v29, 6.0  ;;  %v494_v35 = vmax.f32 %v430_v29, 0.0 }
 0x17c   : > { %v1224_v34 = vpop.eup %1223  ;;  %1241 = vrcp.f32 %v555_v1  ;;  %v433_v36 = vmul.f32 6.0, %v1222_v17  ;;  %v556_v39 = vmul.f32 %v540_v47, %v524_v7  ;;  %v463_v40 = vmax.f32 %v447_v30, 0.0 }
 0x17d   : > { %v1226_v38 = vpop.eup %1225  ;;  %v462_v43 = vmax.f32 %v446_v26, 0.0  ;;  %v432_v44 = vmul.f32 6.0, %v1224_v34  ;;  %v511_v49 = vmul.f32 %v495_v31, %v479_v63  ;;  %v510_v41 = vmul.f32 %v494_v35, %v478_v33 }
 0x17e   : > { %v1228_v46 = vpop.eup %1227  ;;  %v449_v32 = vsub.f32 0.0, %v433_v36  ;;  %v481_v37 = vmin.f32 %v433_v36, 6.0  ;;  %v497_v42 = vmax.f32 %v433_v36, 0.0  ;;  %1243 = vrcp.f32 %v554_v16 }
 0x17f   : > { %v1230_v51 = vpop.eup %1229  ;;  %v448_v53 = vsub.f32 0.0, %v432_v44  ;;  %v480_v54 = vmin.f32 %v432_v44, 6.0  ;;  %v496_v57 = vmax.f32 %v432_v44, 0.0  ;;  %v526_v59 = vsub.f32 %v462_v43, %v510_v41 }
 0x180   : > { %v435_v60 = vmul.f32 6.0, %v1226_v38  ;;  %v1232_v50 = vpop.eup %1231  ;;  %v557_v61 = vmul.f32 %v541_v20, %v525_v19  ;;  %v434_v2 = vmul.f32 6.0, %v1228_v46  ;;  %1245 = vrcp.f32 %v556_v39 }
 0x181   : > { %v464_v0 = vmax.f32 %v448_v53, 0.0  ;;  %v512_v55 = vmul.f32 %v496_v57, %v480_v54  ;;  %v527_v5 = vsub.f32 %v463_v40, %v511_v49  ;;  %v542_v6 = vadd.f32 3.0, %v1663_v45 }
 0x182   : > { %v1234_v3 = vpop.eup %1233  ;;  %v582_v8 = vmul.f32 0.5, %v1230_v51  ;;  %v465_v11 = vmax.f32 %v449_v32, 0.0  ;;  %v513_v62 = vmul.f32 %v497_v42, %v481_v37  ;;  %v450_v12 = vsub.f32 0.0, %v434_v2 }
 0x183   : > { %v1236_v4 = vpop.eup %1235  ;;  %v482_v13 = vmin.f32 %v434_v2, 6.0  ;;  %v558_v15 = vmul.f32 %v542_v6, %v526_v59  ;;  %v528_v9 = vsub.f32 %v464_v0, %v512_v55  ;;  %v451_v18 = vsub.f32 0.0, %v435_v60 }
 0x184   : > { %v1238_v14 = vpop.eup %1237  ;;  %v498_v10 = vmax.f32 %v434_v2, 0.0  ;;  %v483_v22 = vmin.f32 %v435_v60, 6.0  ;;  %v499_v23 = vmax.f32 %v435_v60, 0.0  ;;  %v466_v24 = vmax.f32 %v450_v12, 0.0 }
 0x185   : > { %v1240_v20 = vpop.eup %1239  ;;  %v580_v28 = vmul.f32 0.5, %v1234_v3  ;;  %v544_v25 = vadd.f32 3.0, %v1670_v52  ;;  %v581_v27 = vmul.f32 0.5, %v1232_v50  ;;  %1247 = vrcp.f32 %v557_v61  ;;  %v888_v50 = vld [vmem:[%s1772_s2 + $0x1] ss:$0 sm:$0xff] }
 0x186   : > { %v1242_v1 = vpop.eup %1241  ;;  %v514_v45 = vmul.f32 %v498_v10, %v482_v13  ;;  %v543_v7 = vadd.f32 3.0, %v1656_v21  ;;  %1249 = vrcp.f32 %v558_v15  ;;  %v584_v47 = vmul.f32 0.5, %v1240_v20 }
 0x187   : > { %1048 = vmatprep.mubr.f32.mxu1 %v580_v28  ;;  %v560_v30 = vmul.f32 %v544_v25, %v528_v9  ;;  %v529_v31 = vsub.f32 %v465_v11, %v513_v62  ;;  %v467_v17 = vmax.f32 %v451_v18, 0.0  ;;  %v515_v16 = vmul.f32 %v499_v23, %v483_v22 }
 0x188   : > { %v530_v29 = vsub.f32 %v466_v24, %v514_v45  ;;  %1049 = vmatmul.mubr.f32.vlgmr.msra.gmra.mrb[0].mxu1 %v581_v27  ;;  %v559_v63 = vmul.f32 %v543_v7, %v527_v5  ;;  %v1244_v26 = vpop.eup %1243  ;;  %v546_v33 = vadd.f32 3.0, %v1674_v58  ;;  %v583_v52 = vmul.f32 0.5, %v1236_v4 }
 0x189   : > { %1051 = vmatprep.mubr.f32.mxu1 %v582_v8  ;;  %v545_v34 = vadd.f32 3.0, %v1665_v48  ;;  %1251 = vrcp.f32 %v560_v30  ;;  %v531_v36 = vsub.f32 %v467_v17, %v515_v16  ;;  %v586_v38 = vmul.f32 0.5, %v1244_v26 }
 0x18a   : > { %v1246_v19 = vpop.eup %1245  ;;  %v562_v21 = vmul.f32 %v546_v33, %v530_v29  ;;  %1253 = vrcp.f32 %v559_v63  ;;  %v585_v39 = vmul.f32 0.5, %v1238_v14  ;;  %v547_v40 = vadd.f32 3.0, %v1672_v56 }
 0x18b   : > { %v561_v35 = vmul.f32 %v545_v34, %v529_v31  ;;  %v588_v44 = vmul.f32 0.5, %v1246_v19  ;;  %v587_v46 = vmul.f32 0.5, %v1242_v1 }
 0x18c   : > { %1052 = vmatmul.mubr.f32.gmra.mrb[2].mxu1 %v583_v52  ;;  %1255 = vrcp.f32 %v562_v21  ;;  %v563_v58 = vmul.f32 %v547_v40, %v531_v36 }
 0x18d   : > { %1054 = vmatprep.mubr.f32.mxu1 %v584_v47  ;;  %1257 = vrcp.f32 %v561_v35 }
 0x18e   : > { %1259 = vrcp.f32 %v563_v58 }
 0x18f   : > { %v1248_v43 = vpop.eup %1247 }
 0x190   : > { %1055 = vmatmul.mubr.f32.gmra.mrb[4].mxu1 %v585_v39  ;;  %v1250_v48 = vpop.eup %1249  ;;  %v589_v32 = vmul.f32 0.5, %v1248_v43 }
 0x191   : > { %1057 = vmatprep.mubr.f32.mxu1 %v586_v38  ;;  %v590_v49 = vmul.f32 0.5, %v1250_v48 }
 0x193   : > { %v1252_v41 = vpop.eup %1251 }
 0x194   : > { %1058 = vmatmul.mubr.f32.gmra.mrb[6].mxu1 %v587_v46  ;;  %v1254_v37 = vpop.eup %1253  ;;  %v592_v51 = vmul.f32 0.5, %v1252_v41 }
 0x195   : > { %1060 = vmatprep.mubr.f32.mxu1 %v588_v44  ;;  %v591_v42 = vmul.f32 0.5, %v1254_v37 }
 0x196   : > { %v1256_v56 = vpop.eup %1255 }
 0x197   : > { %v1258_v53 = vpop.eup %1257  ;;  %v594_v54 = vmul.f32 0.5, %v1256_v56 }
 0x198   : > { %1061 = vmatmul.mubr.f32.gmra.mrb[8].mxu1 %v589_v32  ;;  %v593_v57 = vmul.f32 0.5, %v1258_v53  ;;  %v1260_v59 = vpop.eup %1259 }
 0x199   : > { %1063 = vmatprep.mubr.f32.mxu1 %v590_v49  ;;  %v595_v60 = vmul.f32 0.5, %v1260_v59 }
 0x19c   : > { %1064 = vmatmul.mubr.f32.gmra.mrb[10].mxu1 %v591_v42 }
 0x19d   : > { %1066 = vmatprep.mubr.f32.mxu1 %v592_v51 }
 0x1a0   : > { %1067 = vmatmul.mubr.f32.gmra.mrb[12].mxu1 %v593_v57 }
 0x1a1   : > { %1069 = vmatprep.mubr.f32.mxu1 %v594_v54 }
 0x1a4   : > { %1070 = vmatmul.mubr.f32.gmra.mrb[14].mxu1 %v595_v60 }
 0x25b   : > { %v1050_v61 = vpop.f32.mrb[0].mxu1 }
 0x25c   : > { %v690_v0 = vadd.f32 %v1050_v61, %v888_v50  ;;  %v684_v55 = vpop.f32.mrb[1].mxu1 }
 0x25d   : > { %v685_v2 = vadd.f32 %v888_v50, %v684_v55 }
 0x25e   : > { %764 = vst [vmem:[%s1701_s4 + $0x8] sm:$0xff] %v690_v0 }
 0x25f   : > { %763 = vst [vmem:[%s1701_s4] sm:$0xff] %v685_v2  ;;  %v1053_v3 = vpop.f32.mrb[2].mxu1 }
 0x260   : > { %v700_v5 = vadd.f32 %v1053_v3, %v888_v50  ;;  %v694_v6 = vpop.f32.mrb[3].mxu1 }
 0x261   : > { %v695_v8 = vadd.f32 %v888_v50, %v694_v6 }
 0x262   : > { %766 = vst [vmem:[%s1701_s4 + $0x18] sm:$0xff] %v700_v5 }
 0x263   : > { %765 = vst [vmem:[%s1701_s4 + $0x10] sm:$0xff] %v695_v8  ;;  %v1056_v4 = vpop.f32.mrb[4].mxu1 }
 0x264   : > { %v710_v11 = vadd.f32 %v1056_v4, %v888_v50  ;;  %v704_v62 = vpop.f32.mrb[5].mxu1 }
 0x265   : > { %v705_v12 = vadd.f32 %v888_v50, %v704_v62 }
 0x266   : > { %768 = vst [vmem:[%s1701_s4 + $0x28] sm:$0xff] %v710_v11 }
 0x267   : > { %767 = vst [vmem:[%s1701_s4 + $0x20] sm:$0xff] %v705_v12  ;;  %v1059_v13 = vpop.f32.mrb[6].mxu1 }
 0x268   : > { %v720_v14 = vadd.f32 %v1059_v13, %v888_v50  ;;  %v714_v15 = vpop.f32.mrb[7].mxu1 }
 0x269   : > { %v715_v9 = vadd.f32 %v888_v50, %v714_v15 }
 0x26a   : > { %770 = vst [vmem:[%s1701_s4 + $0x38] sm:$0xff] %v720_v14 }
 0x26b   : > { %769 = vst [vmem:[%s1701_s4 + $0x30] sm:$0xff] %v715_v9  ;;  %v1062_v18 = vpop.f32.mrb[8].mxu1 }
 0x26c   : > { %v730_v10 = vadd.f32 %v1062_v18, %v888_v50  ;;  %v724_v20 = vpop.f32.mrb[9].mxu1 }
 0x26d   : > { %v725_v22 = vadd.f32 %v888_v50, %v724_v20 }
 0x26e   : > { %772 = vst [vmem:[%s1701_s4 + $0x48] sm:$0xff] %v730_v10 }
 0x26f   : > { %771 = vst [vmem:[%s1701_s4 + $0x40] sm:$0xff] %v725_v22  ;;  %v1065_v23 = vpop.f32.mrb[10].mxu1 }
 0x270   : > { %v740_v24 = vadd.f32 %v1065_v23, %v888_v50  ;;  %v734_v28 = vpop.f32.mrb[11].mxu1 }
 0x271   : > { %v735_v1 = vadd.f32 %v888_v50, %v734_v28 }
 0x272   : > { %774 = vst [vmem:[%s1701_s4 + $0x58] sm:$0xff] %v740_v24 }
 0x273   : > { %773 = vst [vmem:[%s1701_s4 + $0x50] sm:$0xff] %v735_v1  ;;  %v1068_v25 = vpop.f32.mrb[12].mxu1 }
 0x274   : > { %v750_v45 = vadd.f32 %v1068_v25, %v888_v50  ;;  %v744_v27 = vpop.f32.mrb[13].mxu1 }
 0x275   : > { %v745_v7 = vadd.f32 %v888_v50, %v744_v27 }
 0x276   : > { %776 = vst [vmem:[%s1701_s4 + $0x68] sm:$0xff] %v750_v45 }
 0x277   : > { %775 = vst [vmem:[%s1701_s4 + $0x60] sm:$0xff] %v745_v7  ;;  %v1071_v30 = vpop.f32.mrb[14].mxu1 }
 0x278   : > { %v760_v29 = vadd.f32 %v1071_v30, %v888_v50  ;;  %v754_v47 = vpop.f32.mrb[15].mxu1 }
 0x279   : > { %v755_v63 = vadd.f32 %v888_v50, %v754_v47 }
 0x27a   : > { %778 = vst [vmem:[%s1701_s4 + $0x78] sm:$0xff] %v760_v29 }
 0x27b   : > { %777 = vst [vmem:[%s1701_s4 + $0x70] sm:$0xff] %v755_v63 }
 0x27c   : > { %1332 = shalt.err (!%p1329_p7)
}
 0x27d   : > { %s1333_s7 = scalar_lea.hbm %s1722_s28, 2048  ;;  %s1337_s18 = scalar_lea.hbm %s1773_s3, 4096 }
 0x27e   : > { %p1334_p9 = scmp.ne.s32.totalorder %s1722_s28, %s1333_s7  ;;  %p1338_p5 = scmp.lt.u32.totalorder %s1722_s28, %s1773_s3 }
 0x27f   : > { %p1339_p11 = scmp.lt.u32.totalorder %s1337_s18, %s1333_s7  ;;  %p1341_p4 = scmp.lt.u32.totalorder %s1333_s7, %s1722_s28 }
 0x280   : > { %p1335_p1 = pnand %p1334_p9, %p1512_p12 }
 0x281   : > { %p1340_p2 = por %p1339_p11, %p1338_p5 }
 0x282   : > { %p1336_p0 = pneg %p1335_p1 }
 0x283   : > { %p1342_p6 = por %p1341_p4, %p1340_p2 }
 0x285   : > { %p1343_p8 = pnand %p1342_p6, %p1336_p0 }
 0x287   : > { %1346 = shalt.err (!%p1343_p8)
}
 0x288   : > { %s1396_s9 = smov 128   ;;  %s1397_s4 = smov 8  }
 0x289   : > { %1142 = dma.vmem_to_hbm [thread:$0]  (%p1512_p12), %s1724_s5, 2048, %s1722_s28, %s780_s16, %s1396_s9, %s1396_s9, %s1397_s4  }
 0x28a PF: > { %s808_s25 = sand.u32 1, %s1377_s12   ;;  %p1788_p10 = scmp.ne.s32.totalorder %s1778_s19, 0 }
 0x28b   : > { %p1789_p13 = scmp.ge.s32.totalorder %s1389_s15, 2  ;;  %s809_s11 = scalar_lea.sflag [#allocation4], %s808_s25 }
 0x28d   : > { %p1153_p3 = pnand %p1789_p13, %p1788_p10 }
 0x28f   : > { %1372 = dma.done.wait (!%p1153_p3), %s809_s11, 2048  }
 0x290   : > { %1374 = vsyncadd (!%p1153_p3), %s809_s11, 4294965248  ;;  %p17_p7 = scmp.ge.s32.totalorder %s1474_s24, 4   ;;  %s1790_s12 = smov %s1381_s13 }
 0x291   : > { %s1791_s13 = smov %s1385_s14  ;;  %s1792_s14 = smov %s1508_s17 }
 0x292   : > { %s1793_s15 = smov %s1474_s24  ;;  %19 = sbr.rel (!%p17_p7) target bundleno = 6 (0x6), region = 82 }
 0x299   :  { %814 = vsyncpa [#allocation3], 1 }
 0x29a   :  { %816 = vsyncpa [#allocation3 + $0x1], 1 }
 0x29b   :  { %817 = vsyncpa [#allocation6], 1 }
 0x29c   :  { %818 = vsyncpa [#allocation4], 1 }
 0x29d   :  { %820 = vsyncpa [#allocation4 + $0x1], 1 }

</bundles_post_ra>
